<compile_context>
chip_gen: v5e
topology: v5e:2x2
jax: 0.10.0
libtpu: 0.0.40
codegen_flags: <defaults>
</compile_context>

<pallas_src>
import jax
import jax.numpy as jnp
from jax.experimental import pallas as pl
from jax.experimental.pallas import tpu as pltpu


def _round_up(x, m):
    return ((x + m - 1) // m) * m


def _pad2(x, rows, cols):
    return jnp.pad(x, ((0, rows - x.shape[0]), (0, cols - x.shape[1])))


def _sigmoid(x):
    # One EUP op instead of exp + exact divide (VALU).
    return 0.5 * (jnp.tanh(0.5 * x) + 1.0)


def rbm_kernel(v_ref, u_ref, w_ref, hb_ref, wt_ref, vb_ref, pv_ref, ph_ref):
    # p(h|v) = sigmoid(v @ W + h_bias); MXU accumulates in f32.
    ph = _sigmoid(
        jnp.dot(v_ref[...], w_ref[...], preferred_element_type=jnp.float32)
        + hb_ref[...]
    )
    ph_ref[...] = ph.astype(ph_ref.dtype)

    # h_sample = bernoulli(p_h): 1 iff u < p (exact 0/1, cast to matmul dtype).
    h_sample = (u_ref[...] < ph).astype(wt_ref.dtype)

    # p(v|h) = sigmoid(h_sample @ W^T + v_bias); W^T is pre-transposed.
    pv = _sigmoid(
        jnp.dot(h_sample, wt_ref[...], preferred_element_type=jnp.float32)
        + vb_ref[...]
    )
    pv_ref[...] = pv.astype(pv_ref.dtype)


def rbm_forward(v, w, h_bias, v_bias, u, *, block_batch=512, use_bf16_matmul=True):
    """Fused RBM forward. Returns (p_v_given_h, p_h_given_v).

    v: (B, V) f32, w: (V, H) f32, h_bias: (H,), v_bias: (V,),
    u: (B, H) uniform [0,1) randoms driving the Bernoulli sample.
    """
    B, V = v.shape
    H = w.shape[1]

    # Lane-dense padding (multiples of 128) and sublane-friendly batch tiling.
    Vp = _round_up(V, 128)
    Hp = _round_up(H, 128)
    tb = min(_round_up(block_batch, 8), _round_up(B, 8))
    Bp = _round_up(B, tb)

    dot_dt = jnp.bfloat16 if use_bf16_matmul else jnp.float32

    v_p = _pad2(v, Bp, Vp).astype(dot_dt)           # streamed per grid step
    u_p = _pad2(u, Bp, Hp).astype(jnp.float32)      # streamed per grid step
    w_p = _pad2(w, Vp, Hp).astype(dot_dt)           # VMEM-resident
    wt_p = jnp.transpose(w_p)                       # VMEM-resident (H, V)
    hb_p = _pad2(h_bias.reshape(1, H).astype(jnp.float32), 1, Hp)
    vb_p = _pad2(v_bias.reshape(1, V).astype(jnp.float32), 1, Vp)

    grid = (Bp // tb,)
    batch_map = lambda i: (i, 0)
    resident = lambda i: (0, 0)

    pv_p, ph_p = pl.pallas_call(
        rbm_kernel,
        out_shape=(
            jax.ShapeDtypeStruct((Bp, Vp), jnp.float32),
            jax.ShapeDtypeStruct((Bp, Hp), jnp.float32),
        ),
        grid=grid,
        in_specs=[
            pl.BlockSpec((tb, Vp), batch_map),   # v tile
            pl.BlockSpec((tb, Hp), batch_map),   # uniform randoms tile
            pl.BlockSpec((Vp, Hp), resident),    # W
            pl.BlockSpec((1, Hp), resident),     # h_bias
            pl.BlockSpec((Hp, Vp), resident),    # W^T
            pl.BlockSpec((1, Vp), resident),     # v_bias
        ],
        out_specs=[
            pl.BlockSpec((tb, Vp), batch_map),   # p_v_given_h
            pl.BlockSpec((tb, Hp), batch_map),   # p_h_given_v
        ],
        compiler_params=pltpu.CompilerParams(
            dimension_semantics=("parallel",),
        ),
    )(v_p, u_p, w_p, hb_p, wt_p, vb_p)

    return pv_p[:B, :V], ph_p[:B, :H]


def reference_forward(v, w, h_bias, v_bias, u, *, use_bf16_matmul=True):
    dt = jnp.bfloat16 if use_bf16_matmul else jnp.float32
    ph = _sigmoid(
        jnp.dot(v.astype(dt), w.astype(dt), preferred_element_type=jnp.float32)
        + h_bias[None, :]
    )
    h_sample = (u < ph).astype(dt)
    pv = _sigmoid(
        jnp.dot(h_sample, w.T.astype(dt), preferred_element_type=jnp.float32)
        + v_bias[None, :]
    )
    return pv, ph


if __name__ == "__main__":
    # RBM(visible_units=32, hidden_units=64); visible = 8 electrodes * 4 chans.
    visible_units, hidden_units = 32, 64
    batch = 32  # small, but a multiple of 8 so MXU/vreg rows are filled

    key = jax.random.PRNGKey(0)
    kv, kw, kvb, khb, ku = jax.random.split(key, 5)

    v = jax.random.normal(kv, (batch, visible_units), dtype=jnp.float32)
    w = jax.random.normal(kw, (visible_units, hidden_units), dtype=jnp.float32)
    v_bias = jax.random.normal(kvb, (visible_units,), dtype=jnp.float32)
    h_bias = jax.random.normal(khb, (hidden_units,), dtype=jnp.float32)
    # Uniform randoms standing in for torch.bernoulli's RNG draws.
    u = jax.random.uniform(ku, (batch, hidden_units), dtype=jnp.float32)

    # block_batch=16 so the demo exercises a multi-step parallel batch grid.
    p_v, p_h = rbm_forward(v, w, h_bias, v_bias, u, block_batch=16)
    p_v, p_h = jax.block_until_ready((p_v, p_h))

    ref_pv, ref_ph = reference_forward(v, w, h_bias, v_bias, u)

    assert p_v.shape == (batch, visible_units)
    assert p_h.shape == (batch, hidden_units)
    assert jnp.allclose(p_h, ref_ph, atol=1e-4, rtol=1e-4), "p_h mismatch"
    assert jnp.allclose(p_v, ref_pv, atol=1e-4, rtol=1e-4), "p_v mismatch"

    print("KERNEL_OK")
</pallas_src>

<mosaic_0001>
module attributes {stable_mosaic.version = 11 : i64} {
  func.func @rbm_kernel(%arg0: i32, %arg1: memref<16x128xbf16, #tpu.memory_space<vmem>>, %arg2: memref<16x128xf32, #tpu.memory_space<vmem>>, %arg3: memref<128x128xbf16, #tpu.memory_space<vmem>>, %arg4: memref<1x128xf32, #tpu.memory_space<vmem>>, %arg5: memref<128x128xbf16, #tpu.memory_space<vmem>>, %arg6: memref<1x128xf32, #tpu.memory_space<vmem>>, %arg7: memref<16x128xf32, #tpu.memory_space<vmem>>, %arg8: memref<16x128xf32, #tpu.memory_space<vmem>>) attributes {dimension_semantics = [#tpu.dimension_semantics<parallel>], iteration_bounds = array<i64: 2>, scalar_prefetch = 0 : i64, scratch_operands = 0 : i64, tpu.core_type = #tpu.core_type<tc>, window_params = [{transform_indices = @transform_0, window_bounds = array<i64: 16, 128>}, {transform_indices = @transform_1, window_bounds = array<i64: 16, 128>}, {pipeline_mode = #tpu.pipeline_mode<synchronous>, transform_indices = @transform_2, window_bounds = array<i64: 128, 128>}, {pipeline_mode = #tpu.pipeline_mode<synchronous>, transform_indices = @transform_3, window_bounds = array<i64: 1, 128>}, {pipeline_mode = #tpu.pipeline_mode<synchronous>, transform_indices = @transform_4, window_bounds = array<i64: 128, 128>}, {pipeline_mode = #tpu.pipeline_mode<synchronous>, transform_indices = @transform_5, window_bounds = array<i64: 1, 128>}, {transform_indices = @transform_6, window_bounds = array<i64: 16, 128>}, {transform_indices = @transform_7, window_bounds = array<i64: 16, 128>}]} {
    %c0 = arith.constant 0 : index
    %c0_0 = arith.constant 0 : index
    %0 = vector.load %arg1[%c0, %c0_0] : memref<16x128xbf16, #tpu.memory_space<vmem>>, vector<16x128xbf16>
    %c0_1 = arith.constant 0 : index
    %c0_2 = arith.constant 0 : index
    %1 = vector.load %arg3[%c0_1, %c0_2] : memref<128x128xbf16, #tpu.memory_space<vmem>>, vector<128x128xbf16>
    %cst = arith.constant dense<0.000000e+00> : vector<16x128xf32>
    %2 = tpu.matmul %0, %1, %cst {dimension_numbers = #tpu.dot_dimension_numbers<[1], [0], [0], [1], [0, 0, 1, 1], [], []>} : vector<16x128xbf16>, vector<128x128xbf16>, vector<16x128xf32> -> vector<16x128xf32>
    %c0_3 = arith.constant 0 : index
    %c0_4 = arith.constant 0 : index
    %3 = vector.load %arg4[%c0_3, %c0_4] : memref<1x128xf32, #tpu.memory_space<vmem>>, vector<1x128xf32>
    %4 = vector.broadcast %3 : vector<1x128xf32> to vector<16x128xf32>
    %5 = arith.addf %2, %4 : vector<16x128xf32>
    %cst_5 = arith.constant 5.000000e-01 : f32
    %6 = vector.broadcast %cst_5 : f32 to vector<16x128xf32>
    %7 = arith.mulf %6, %5 : vector<16x128xf32>
    %8 = math.tanh %7 : vector<16x128xf32>
    %cst_6 = arith.constant 1.000000e+00 : f32
    %9 = vector.broadcast %cst_6 : f32 to vector<16x128xf32>
    %10 = arith.addf %8, %9 : vector<16x128xf32>
    %cst_7 = arith.constant 5.000000e-01 : f32
    %11 = vector.broadcast %cst_7 : f32 to vector<16x128xf32>
    %12 = arith.mulf %11, %10 : vector<16x128xf32>
    %c0_8 = arith.constant 0 : index
    %c0_9 = arith.constant 0 : index
    %13 = vector.load %arg8[%c0_8, %c0_9] : memref<16x128xf32, #tpu.memory_space<vmem>>, vector<16x128xf32>
    tpu.vector_store %arg8[%c0_8, %c0_9], %12 {strides = array<i32>} : memref<16x128xf32, #tpu.memory_space<vmem>>, vector<16x128xf32>,
    %c0_10 = arith.constant 0 : index
    %c0_11 = arith.constant 0 : index
    %14 = vector.load %arg2[%c0_10, %c0_11] : memref<16x128xf32, #tpu.memory_space<vmem>>, vector<16x128xf32>
    %15 = arith.cmpf olt, %14, %12 : vector<16x128xf32>
    %16 = arith.extui %15 : vector<16x128xi1> to vector<16x128xi32>
    %17 = arith.sitofp %16 : vector<16x128xi32> to vector<16x128xf32>
    %18 = arith.truncf %17 : vector<16x128xf32> to vector<16x128xbf16>
    %c0_12 = arith.constant 0 : index
    %c0_13 = arith.constant 0 : index
    %19 = vector.load %arg5[%c0_12, %c0_13] : memref<128x128xbf16, #tpu.memory_space<vmem>>, vector<128x128xbf16>
    %cst_14 = arith.constant dense<0.000000e+00> : vector<16x128xf32>
    %20 = tpu.matmul %18, %19, %cst_14 {dimension_numbers = #tpu.dot_dimension_numbers<[1], [0], [0], [1], [0, 0, 1, 1], [], []>} : vector<16x128xbf16>, vector<128x128xbf16>, vector<16x128xf32> -> vector<16x128xf32>
    %c0_15 = arith.constant 0 : index
    %c0_16 = arith.constant 0 : index
    %21 = vector.load %arg6[%c0_15, %c0_16] : memref<1x128xf32, #tpu.memory_space<vmem>>, vector<1x128xf32>
    %22 = vector.broadcast %21 : vector<1x128xf32> to vector<16x128xf32>
    %23 = arith.addf %20, %22 : vector<16x128xf32>
    %cst_17 = arith.constant 5.000000e-01 : f32
    %24 = vector.broadcast %cst_17 : f32 to vector<16x128xf32>
    %25 = arith.mulf %24, %23 : vector<16x128xf32>
    %26 = math.tanh %25 : vector<16x128xf32>
    %cst_18 = arith.constant 1.000000e+00 : f32
    %27 = vector.broadcast %cst_18 : f32 to vector<16x128xf32>
    %28 = arith.addf %26, %27 : vector<16x128xf32>
    %cst_19 = arith.constant 5.000000e-01 : f32
    %29 = vector.broadcast %cst_19 : f32 to vector<16x128xf32>
    %30 = arith.mulf %29, %28 : vector<16x128xf32>
    %c0_20 = arith.constant 0 : index
    %c0_21 = arith.constant 0 : index
    %31 = vector.load %arg7[%c0_20, %c0_21] : memref<16x128xf32, #tpu.memory_space<vmem>>, vector<16x128xf32>
    tpu.vector_store %arg7[%c0_20, %c0_21], %30 {strides = array<i32>} : memref<16x128xf32, #tpu.memory_space<vmem>>, vector<16x128xf32>,
    return
  }
  func.func @transform_0(%arg0: i32) -> (i32, i32) {
    %c0_i32 = arith.constant 0 : i32
    %c0_i32_0 = arith.constant 0 : i32
    return %arg0, %c0_i32 : i32, i32
  }
  func.func @transform_1(%arg0: i32) -> (i32, i32) {
    %c0_i32 = arith.constant 0 : i32
    %c0_i32_0 = arith.constant 0 : i32
    return %arg0, %c0_i32 : i32, i32
  }
  func.func @transform_2(%arg0: i32) -> (i32, i32) {
    %c0_i32 = arith.constant 0 : i32
    %c0_i32_0 = arith.constant 0 : i32
    %c0_i32_1 = arith.constant 0 : i32
    return %c0_i32, %c0_i32_0 : i32, i32
  }
  func.func @transform_3(%arg0: i32) -> (i32, i32) {
    %c0_i32 = arith.constant 0 : i32
    %c0_i32_0 = arith.constant 0 : i32
    %c0_i32_1 = arith.constant 0 : i32
    return %c0_i32, %c0_i32_0 : i32, i32
  }
  func.func @transform_4(%arg0: i32) -> (i32, i32) {
    %c0_i32 = arith.constant 0 : i32
    %c0_i32_0 = arith.constant 0 : i32
    %c0_i32_1 = arith.constant 0 : i32
    return %c0_i32, %c0_i32_0 : i32, i32
  }
  func.func @transform_5(%arg0: i32) -> (i32, i32) {
    %c0_i32 = arith.constant 0 : i32
    %c0_i32_0 = arith.constant 0 : i32
    %c0_i32_1 = arith.constant 0 : i32
    return %c0_i32, %c0_i32_0 : i32, i32
  }
  func.func @transform_6(%arg0: i32) -> (i32, i32) {
    %c0_i32 = arith.constant 0 : i32
    %c0_i32_0 = arith.constant 0 : i32
    return %arg0, %c0_i32 : i32, i32
  }
  func.func @transform_7(%arg0: i32) -> (i32, i32) {
    %c0_i32 = arith.constant 0 : i32
    %c0_i32_0 = arith.constant 0 : i32
    return %arg0, %c0_i32 : i32, i32
  }
}

</mosaic_0001>

<bundles_post_ra>
// kernel: tpu_custom_call.1
= control target key start
LH: loop header
LB: loop body
LE: loop exit
PB: predicated region body
PF: predicated region fallthrough
CT: control target
= control target key end

     0   :  { %s1496_s0 = inlined_call_operand.hbm [shape: bf16[32,128], index: 0, kind: input, shape index: {}]   ;;  %s1497_s1 = inlined_call_operand.hbm [shape: f32[32,128], index: 1, kind: input, shape index: {}]   ;;  %s1498_s2 = inlined_call_operand.hbm [shape: bf16[128,128], index: 2, kind: input, shape index: {}]   ;;  %s1499_s3 = inlined_call_operand.vmem [shape: f32[1,128], index: 3, kind: input, shape index: {}]   ;;  %s1500_s4 = inlined_call_operand.hbm [shape: bf16[128,128], index: 4, kind: input, shape index: {}]   ;;  %s1501_s5 = inlined_call_operand.vmem [shape: f32[1,128], index: 5, kind: input, shape index: {}]   ;;  %s1502_s6 = inlined_call_operand.hbm [shape: f32[32,128], index: 6, kind: output, shape index: {0}]   ;;  %s1503_s7 = inlined_call_operand.hbm [shape: f32[32,128], index: 7, kind: output, shape index: {1}]  }
   0x1   :  { %1510 = sst [smem:[#allocation23_spill]] %s1498_s2 }
   0x2   :  { %1511 = sst [smem:[#allocation24_spill]] %s1500_s4 }
   0x3   :  { %13 = vsyncpa [#allocation3], 0 }
   0x4   :  { %15 = vsyncpa [#allocation3 + $0x1], 0 }
   0x5   :  { %16 = vsyncpa [#allocation6], 0 }
   0x6   :  { %18 = vsyncpa [#allocation6 + $0x1], 0 }
   0x7   :  { %19 = vsyncpa [#allocation9], 0 }
   0x8   :  { %20 = vsyncpa [#allocation4], 0 }
   0x9   :  { %22 = vsyncpa [#allocation4 + $0x1], 0 }
   0xa   :  { %23 = vsyncpa [#allocation12], 0 }
   0xb   :  { %25 = vsyncpa [#allocation12 + $0x1], 0  ;;  %s1270_s24 = smov 0   ;;  %s1272_s25 = smov 0  }
   0xc   :  { %s1274_s26 = smov 0   ;;  %s1276_s27 = smov 0  }
   0xd LB: > { %1512 = sst [smem:[#allocation19_spill]] %s1215_s26  ;;  %s1291_s28 = sadd.s32 4294967295, %s1219_s27   ;;  %s1219_s27 = sphi %s1276_s27, %s1527_s27   ;;  %s1215_s26 = sphi %s1274_s26, %s1529_s26   ;;  %s1211_s25 = sphi %s1272_s25, %s1531_s25   ;;  %s1207_s24 = sphi %s1270_s24, %s1530_s24  }
   0xe   : > { %s776_s29 = sadd.s32 4294967294, %s1219_s27   ;;  %p51_p0 = scmp.ne.s32.totalorder %s1211_s25, %s1207_s24 }
   0xf   : > { %p52_p1 = scmp.eq.s32.totalorder %s1291_s28, 0  ;;  %p185_p2 = scmp.eq.s32.totalorder %s1291_s28, 1 }
  0x10   : > { %p191_p3 = scmp.eq.s32.totalorder %s776_s29, 1  ;;  %p777_p5 = scmp.ge.s32.totalorder %s1219_s27, 1 }
  0x11   : > { %p1300_p4 = por %p52_p1, %p51_p0  ;;  %p224_p7 = scmp.lt.s32.totalorder %s1219_s27, 3 }
  0x12   : > { %p1305_p6 = por %p191_p3, %p51_p0  ;;  %s1516_s2 = sld [smem:[#allocation23_spill]] }
  0x13   : > { %p1313_p8 = pnand %p777_p5, %p224_p7  ;;  %s1221_s13 = smov [#allocation7]  }
  0x14   : > { %s1514_s8 = scalar_select %p1305_p6, 1, 0 }
  0x15   : > { %p911_p9 = pneg %p1313_p8  ;;  %s237_s14 = sshll.u32 %s1221_s13, 4  ;;  %s238_s14 = int_to_ptr.vmem [resolvable:$true] %s237_s14 }
  0x16   : > { %1515 = sst [smem:[#allocation20_spill]] %s1514_s8  ;;  %s1504_s18 = smov 64  }
  0x17   : > { %p912_p10 = pnand %p911_p9, %p52_p1  ;;  %s1518_s4 = sld [smem:[#allocation24_spill]] }
  0x18   : > { %s235_s11 = sshll.u32 %s1516_s2, 4  ;;  %s1505_s19 = smov 4   ;;  %s236_s11 = int_to_ptr.hbm [resolvable:$true] %s235_s11 }
  0x19   : > { %914 = dma.hbm_to_vmem [thread:$0]  (!%p912_p10), %s236_s11, 1024, %s238_s14, [#allocation6], %s1504_s18, %s1504_s18, %s1505_s19  }
  0x1a   : > { %s1224_s20 = smov [#allocation8]   ;;  %s1332_s22 = sadd.s32 1, %s1219_s27  }
  0x1b   : > { %s254_s21 = sshll.u32 %s1224_s20, 4  ;;  %1519 = sst [smem:[#allocation21_spill]] %s1332_s22  ;;  %s255_s21 = int_to_ptr.vmem [resolvable:$true] %s254_s21 }
  0x1c   : > { %s38_s23 = sadd.s32 1, %s1215_s26  ;;  %s35_s29 = ssub.s32 %s1219_s27, %s1332_s22 }
  0x1d   : > { %s252_s17 = sshll.u32 %s1518_s4, 4  ;;  %p45_p12 = scmp.ne.s32.totalorder %s1215_s26, %s1211_s25  ;;  %s253_s17 = int_to_ptr.hbm [resolvable:$true] %s252_s17 }
  0x1e   : > { %917 = dma.hbm_to_vmem [thread:$0]  (!%p912_p10), %s253_s17, 1024, %s255_s21, [#allocation9], %s1504_s18, %s1504_s18, %s1505_s19  }
  0x1f   : > { %p36_p13 = scmp.eq.s32.totalorder %s35_s29, 0  ;;  %p46_p0 = scmp.eq.s32.totalorder %s1219_s27, 0 }
  0x20   : > { %p1342_p3 = por %p185_p2, %p45_p12  ;;  %p934_p5 = scmp.lt.s32.totalorder %s1219_s27, 2 }
  0x21   : > { %s1348_s10 = scalar_select %p36_p13, %s1215_s26, %s38_s23  }
  0x22   : > { %p47_p7 = por %p46_p0, %p45_p12  ;;  %s1351_s11 = sand.u32 1, %s1215_s26  }
  0x23   : > { %1521 = sst [smem:[#allocation22_spill]] %s1348_s10  ;;  %s781_s13 = sshll.u32 %s1351_s11, 3 }
  0x24   : > { %s874_s14 = sshll.u32 %s1219_s27, 3  ;;  %s275_s20 = scalar_lea.vmem [#allocation2], %s781_s13 }
  0x25   : > { %s280_s17 = scalar_lea.hbm %s1496_s0, %s874_s14  ;;  %s283_s21 = sshll.u32 %s275_s20, 4  ;;  %s284_s21 = int_to_ptr.vmem [resolvable:$true] %s283_s21 }
  0x26   : > { %s281_s29 = sshll.u32 %s280_s17, 4  ;;  %p1358_p2 = pnand %p934_p5, %p47_p7  ;;  %s282_s29 = int_to_ptr.hbm [resolvable:$true] %s281_s29 }
  0x27   : > { %s293_s18 = sand.u32 1, %s1219_s27   ;;  %s784_s19 = sshll.u32 %s1351_s11, 4 }
  0x28   : > { %s272_s2 = scalar_lea.sflag [#allocation3], %s1351_s11  ;;  %s1049_s4 = sshra.s32 %s282_s29, 4  ;;  %s1050_s4 = int_to_ptr.hbm [resolvable:$true] %s1049_s4 }
  0x29   : > { %s1051_s10 = scalar_lea.hbm %s1050_s4, 8  ;;  %p1053_p10 = pneg %p1358_p2 }
  0x2a   : > { %p1052_p9 = scmp.ne.s32.totalorder %s1050_s4, %s1051_s10  ;;  %s1056_s15 = scalar_lea.hbm %s1496_s0, 16 }
  0x2b   : > { %p1057_p0 = scmp.lt.s32.totalorder %s1050_s4, %s1496_s0  ;;  %p1058_p5 = scmp.lt.s32.totalorder %s1056_s15, %s1051_s10 }
  0x2c   : > { %p1054_p12 = pnand %p1053_p10, %p1052_p9 }
  0x2d   : > { %p1059_p7 = por %p1058_p5, %p1057_p0 }
  0x2e   : > { %p1055_p13 = pneg %p1054_p12 }
  0x30   : > { %p1060_p11 = pnand %p1059_p7, %p1055_p13 }
  0x32   : > { %1063 = shalt.err (!%p1060_p11)
}
  0x33   : > { %s1523_s11 = smov 4   ;;  %s1524_s20 = smov 64  }
  0x34   : > { %921 = dma.hbm_to_vmem [thread:$0]  (!%p1358_p2), %s282_s29, 128, %s284_s21, %s272_s2, %s1524_s20, %s1524_s20, %s1523_s11  }
  0x35   : > { %s875_s26 = sshll.u32 %s1219_s27, 4  ;;  %s297_s8 = scalar_lea.vmem [#allocation5], %s784_s19 }
  0x36   : > { %s302_s14 = scalar_lea.hbm %s1497_s1, %s875_s26  ;;  %s305_s16 = sshll.u32 %s297_s8, 4  ;;  %s306_s16 = int_to_ptr.vmem [resolvable:$true] %s305_s16 }
  0x37   : > { %s303_s4 = sshll.u32 %s302_s14, 4  ;;  %s294_s10 = scalar_lea.sflag [#allocation6], %s293_s18  ;;  %s304_s4 = int_to_ptr.hbm [resolvable:$true] %s303_s4 }
  0x38   : > { %s1079_s15 = sshra.s32 %s304_s4, 4  ;;  %s1086_s29 = scalar_lea.hbm %s1497_s1, 32  ;;  %s1080_s15 = int_to_ptr.hbm [resolvable:$true] %s1079_s15 }
  0x39   : > { %s1081_s17 = scalar_lea.hbm %s1080_s15, 16  ;;  %p1087_p13 = scmp.lt.s32.totalorder %s1080_s15, %s1497_s1 }
  0x3a   : > { %p1082_p11 = scmp.ne.s32.totalorder %s1080_s15, %s1081_s17  ;;  %p1088_p0 = scmp.lt.s32.totalorder %s1086_s29, %s1081_s17 }
  0x3c   : > { %p1084_p9 = pnand %p1082_p11, %p1053_p10  ;;  %p1089_p5 = por %p1088_p0, %p1087_p13 }
  0x3e   : > { %p1085_p12 = pneg %p1084_p9 }
  0x40   : > { %p1090_p7 = pnand %p1089_p5, %p1085_p12 }
  0x42   : > { %1093 = shalt.err (!%p1090_p7)
}
  0x43   : > { %s1225_s8 = smov 128   ;;  %s1226_s18 = smov 8  }
  0x44   : > { %924 = dma.hbm_to_vmem [thread:$0]  (!%p1358_p2), %s304_s4, 256, %s306_s16, %s294_s10, %s1225_s8, %s1225_s8, %s1226_s18  }
  0x45   : > { %317 = sbr.rel (%p1313_p8) target bundleno = 417 (0x1a1), region = 44  ;;  %s1399_s19 = sand.u32 (!%p1313_p8), 1, %s1211_s25  }
  0x46   : > { %s788_s11 = sshll.u32 (!%p1313_p8), %s1399_s19, 3  ;;  %s320_s20 = scalar_lea.sflag (!%p1313_p8), [#allocation3], %s1399_s19 }
  0x47   : > { %s1403_s13 = scalar_lea.vmem (!%p1313_p8), [#allocation2], %s788_s11 }
  0x4a   : > { %1182 = dma.done.wait (%p1300_p4), %s320_s20, 128  }
  0x4b   : > { %1184 = vsyncadd (%p1300_p4), %s320_s20, 4294967168  ;;  %s329_s12 = sand.u32 1, %s1291_s28   ;;  %s1411_s23 = sshll.u32 %s1399_s19, 4 }
  0x4c   : > { %s330_s14 = scalar_lea.sflag [#allocation6], %s329_s12  ;;  %s333_s16 = scalar_lea.vmem [#allocation5], %s1411_s23 }
  0x4d   : > { %1186 = dma.done.wait (%p1300_p4), %s330_s14, 256  }
  0x4e   : > { %1188 = vsyncadd (%p1300_p4), %s330_s14, 4294967040 }
  0x4f   : > { %1190 = dma.done.wait (%p52_p1), [#allocation6], 1024  }
  0x50   : > { %1192 = vsyncadd (%p52_p1), [#allocation6], 4294966272 }
  0x51   : > { %1194 = dma.done.wait (%p52_p1), [#allocation9], 1024  }
  0x52   : > { %1196 = vsyncadd (%p52_p1), [#allocation9], 4294966272  ;;  %v884_v0 = vld [vmem:[#allocation7 + $0x38] sm:$0xff]  ;;  %v883_v1 = vld [vmem:[#allocation7 + $0x30] sm:$0xff]  ;;  %s384_s10 = scalar_lea.vmem [#allocation11], %s1411_s23  ;;  %s893_s17 = sshll.u32 %s1291_s28, 4 }
  0x53   : > { %465 = vmatpush.bf16.msra.mxu0 %v884_v0  ;;  %v892_v2 = vld [vmem:[#allocation8 + $0x38] sm:$0xff]  ;;  %v891_v3 = vld [vmem:[#allocation8 + $0x30] sm:$0xff]  ;;  %v882_v4 = vld [vmem:[#allocation7 + $0x28] sm:$0xff]  ;;  %v1227_v32 = vmov 1.0|1.0   ;;  %s625_s15 = sshll.u32 %s384_s10, 4  ;;  %s624_s29 = scalar_lea.hbm %s1503_s7, %s893_s17  ;;  %s626_s15 = int_to_ptr.vmem [resolvable:$true] %s625_s15 }
  0x54   : > { %566 = vmatpush.bf16.msra.mxu1 %v892_v2  ;;  %v881_v5 = vld [vmem:[#allocation7 + $0x20] sm:$0xff]  ;;  %v880_v6 = vld [vmem:[#allocation7 + $0x18] sm:$0xff]  ;;  %v879_v7 = vld [vmem:[#allocation7 + $0x10] sm:$0xff]  ;;  %s627_s22 = sshll.u32 %s624_s29, 4  ;;  %s596_s26 = scalar_lea.sflag [#allocation12], %s1399_s19  ;;  %s628_s22 = int_to_ptr.hbm [resolvable:$true] %s627_s22 }
  0x55   : > { %v878_v8 = vld [vmem:[#allocation7 + $0x8] sm:$0xff]  ;;  %v877_v9 = vld [vmem:[#allocation7] sm:$0xff]  ;;  %v876_v10 = vld [vmem:[%s1403_s13] sm:$0xff]  ;;  %s1123_s8 = sshra.s32 %s628_s22, 4  ;;  %s1129_s13 = scalar_lea.hbm %s1503_s7, 32  ;;  %s1124_s8 = int_to_ptr.hbm [resolvable:$true] %s1123_s8 }
  0x56   : > { %v890_v11 = vld [vmem:[#allocation8 + $0x28] sm:$0xff]  ;;  %v889_v12 = vld [vmem:[#allocation8 + $0x20] sm:$0xff]  ;;  %v888_v13 = vld [vmem:[#allocation8 + $0x18] sm:$0xff]  ;;  %s1125_s18 = scalar_lea.hbm %s1124_s8, 16  ;;  %p1130_p2 = scmp.lt.s32.totalorder %s1124_s8, %s1503_s7 }
  0x57   : > { %466 = vmatpush.bf16.msra.mxu0 %v883_v1  ;;  %v887_v14 = vld [vmem:[#allocation8 + $0x10] sm:$0xff]  ;;  %v886_v15 = vld [vmem:[#allocation8 + $0x8] sm:$0xff]  ;;  %v885_v16 = vld [vmem:[#allocation8] sm:$0xff]  ;;  %p1126_p1 = scmp.ne.s32.totalorder %s1124_s8, %s1125_s18  ;;  %p1131_p10 = scmp.lt.s32.totalorder %s1129_s13, %s1125_s18 }
  0x58   : > { %567 = vmatpush.bf16.msra.mxu1 %v891_v3  ;;  %v979_v17 = vld [vmem:[%s1499_s3] ss:$0 sm:$0xff]  ;;  %v490_v30 = vld [vmem:[%s333_s16 + $0x8] sm:$0xff] }
  0x59   : > { %v489_v29 = vld [vmem:[%s333_s16] sm:$0xff]  ;;  %p1127_p4 = pnand %p1126_p1, %p1342_p3  ;;  %p1132_p11 = por %p1131_p10, %p1130_p2 }
  0x5b   : > { %467 = vmatpush.bf16.msra.mxu0 %v882_v4  ;;  %p1128_p8 = pneg %p1127_p4 }
  0x5c   : > { %568 = vmatpush.bf16.msra.mxu1 %v890_v11 }
  0x5d   : > { %p1133_p9 = pnand %p1132_p11, %p1128_p8 }
  0x5f   : > { %468 = vmatpush.bf16.msra.mxu0 %v881_v5 }
  0x60   : > { %569 = vmatpush.bf16.msra.mxu1 %v889_v12 }
  0x63   : > { %469 = vmatpush.bf16.msra.mxu0 %v880_v6 }
  0x64   : > { %570 = vmatpush.bf16.msra.mxu1 %v888_v13 }
  0x67   : > { %470 = vmatpush.bf16.msra.mxu0 %v879_v7 }
  0x68   : > { %571 = vmatpush.bf16.msra.mxu1 %v887_v14 }
  0x6b   : > { %471 = vmatpush.bf16.msra.mxu0 %v878_v8 }
  0x6c   : > { %572 = vmatpush.bf16.msra.mxu1 %v886_v15 }
  0x6f   : > { %472 = vmatpush.bf16.msra.mxu0 %v877_v9 }
  0x70   : > { %573 = vmatpush.bf16.msra.mxu1 %v885_v16 }
  0x72   : > { %473 = vmatmul.bf16.vlgmr.msra.gmra.mxu0 %v876_v10 }
  0xef   : > { %v474_v18 = vpop.f32.mrf.mxu0 }
  0xf0   : > { %v475_v19 = vadd.f32 %v979_v17, %v474_v18 }
  0xf2   : > { %v479_v20 = vmul.f32 0.5, %v475_v19 }
  0xf4   : > { %981 = vtanh.f32 %v479_v20 }
  0xf7   : > { %v476_v21 = vpop.f32.mrf.mxu0 }
  0xf8   : > { %v477_v22 = vadd.f32 %v979_v17, %v476_v21 }
  0xfa   : > { %v982_v23 = vpop.eup %981  ;;  %v480_v24 = vmul.f32 0.5, %v477_v22 }
  0xfb   : > { %v483_v25 = vadd.f32 1.0, %v982_v23 }
  0xfc   : > { %983 = vtanh.f32 %v480_v24 }
  0xfd   : > { %v485_v26 = vmul.f32 0.5, %v483_v25 }
  0xff   : > { %487 = vst [vmem:[%s384_s10] sm:$0xff] %v485_v26  ;;  %vm491_vm0 = vcmp.lt.f32.partialorder %v489_v29, %v485_v26 }
 0x102   : > { %v984_v27 = vpop.eup %983 }
 0x103   : > { %v484_v28 = vadd.f32 1.0, %v984_v27 }
 0x105   : > { %v486_v31 = vmul.f32 0.5, %v484_v28 }
 0x107   : > { %488 = vst [vmem:[%s384_s10 + $0x8] sm:$0xff] %v486_v31  ;;  %vm492_vm1 = vcmp.lt.f32.partialorder %v490_v30, %v486_v31 }
 0x108   : > { %vm864_vm2 = vmpackc.low %vm492_vm1, %vm491_vm0 }
 0x109   : > { %865 = vmatmul.msk.bf16.vlgmr.msra.gmra.mxu1 %vm864_vm2, %v1227_v32 }
 0x10a   : > { %1136 = shalt.err (!%p1133_p9)
}
 0x10b   : > { %s1228_s16 = smov 128   ;;  %s1229_s30 = smov 8   ;;  %v980_v33 = vld [vmem:[%s1501_s5] ss:$0 sm:$0xff] }
 0x10c   : > { %908 = dma.vmem_to_hbm [thread:$0]  (%p1342_p3), %s626_s15, 256, %s628_s22, %s596_s26, %s1228_s16, %s1228_s16, %s1229_s30  }
 0x10d   : > { %s377_s2 = scalar_lea.vmem [#allocation10], %s1411_s23  ;;  %s607_s29 = scalar_lea.hbm %s1502_s6, %s893_s17 }
 0x10e   : > { %s608_s22 = sshll.u32 %s377_s2, 4  ;;  %s610_s26 = sshll.u32 %s607_s29, 4  ;;  %s609_s22 = int_to_ptr.vmem [resolvable:$true] %s608_s22  ;;  %s611_s26 = int_to_ptr.hbm [resolvable:$true] %s610_s26 }
 0x10f   : > { %s591_s8 = scalar_lea.sflag [#allocation4], %s1399_s19  ;;  %s1151_s18 = sshra.s32 %s611_s26, 4  ;;  %s1152_s18 = int_to_ptr.hbm [resolvable:$true] %s1151_s18 }
 0x110   : > { %s1153_s11 = scalar_lea.hbm %s1152_s18, 16  ;;  %s1157_s17 = scalar_lea.hbm %s1502_s6, 32 }
 0x111   : > { %p1154_p12 = scmp.ne.s32.totalorder %s1152_s18, %s1153_s11  ;;  %p1158_p5 = scmp.lt.s32.totalorder %s1152_s18, %s1502_s6 }
 0x112   : > { %p1159_p7 = scmp.lt.s32.totalorder %s1157_s17, %s1153_s11 }
 0x113   : > { %p1155_p13 = pnand %p1154_p12, %p1342_p3 }
 0x114   : > { %p1160_p1 = por %p1159_p7, %p1158_p5 }
 0x115   : > { %p1156_p0 = pneg %p1155_p13 }
 0x117   : > { %p1161_p4 = pnand %p1160_p1, %p1156_p0 }
 0x186   : > { %v575_v34 = vpop.f32.mrf.mxu1 }
 0x187   : > { %v576_v35 = vadd.f32 %v980_v33, %v575_v34 }
 0x189   : > { %v580_v36 = vmul.f32 0.5, %v576_v35 }
 0x18b   : > { %985 = vtanh.f32 %v580_v36 }
 0x18e   : > { %v577_v37 = vpop.f32.mrf.mxu1 }
 0x18f   : > { %v578_v38 = vadd.f32 %v980_v33, %v577_v37 }
 0x191   : > { %v986_v39 = vpop.eup %985  ;;  %v581_v40 = vmul.f32 0.5, %v578_v38 }
 0x192   : > { %v584_v41 = vadd.f32 1.0, %v986_v39 }
 0x193   : > { %987 = vtanh.f32 %v581_v40 }
 0x194   : > { %v586_v42 = vmul.f32 0.5, %v584_v41 }
 0x196   : > { %588 = vst [vmem:[%s377_s2] sm:$0xff] %v586_v42 }
 0x199   : > { %v988_v43 = vpop.eup %987 }
 0x19a   : > { %v585_v44 = vadd.f32 1.0, %v988_v43 }
 0x19c   : > { %v587_v45 = vmul.f32 0.5, %v585_v44 }
 0x19e   : > { %589 = vst [vmem:[%s377_s2 + $0x8] sm:$0xff] %v587_v45 }
 0x19f   : > { %1164 = shalt.err (!%p1161_p4)
}
 0x1a0   : > { %907 = dma.vmem_to_hbm [thread:$0]  (%p1342_p3), %s609_s22, 256, %s611_s26, %s591_s8, %s1228_s16, %s1228_s16, %s1229_s30  }
 0x1a1 PF: > { %s642_s12 = sand.u32 1, %s1207_s24   ;;  %p1526_p8 = scmp.ge.s32.totalorder %s1219_s27, 2 }
 0x1a2   : > { %s643_s14 = scalar_lea.sflag [#allocation4], %s642_s12 }
 0x1a3   : > { %p926_p2 = pnand %p1526_p8, %p1305_p6 }
 0x1a5   : > { %p927_p10 = pneg %p926_p2 }
 0x1a7   : > { %1198 = dma.done.wait (%p927_p10), %s643_s14, 256  }
 0x1a8   : > { %1200 = vsyncadd (%p927_p10), %s643_s14, 4294967040  ;;  %s653_s4 = scalar_lea.sflag [#allocation12], %s642_s12 }
 0x1a9   : > { %1202 = dma.done.wait (%p927_p10), %s653_s4, 256  }
 0x1aa   : > { %1204 = vsyncadd (%p927_p10), %s653_s4, 4294967040  ;;  %s1527_s27 = sld [smem:[#allocation21_spill]]  ;;  %s1530_s24 = smov %s1211_s25 }
 0x1ab   : > { %s1528_s9 = sld [smem:[#allocation19_spill]] }
 0x1ac   : > { %s1529_s26 = sld [smem:[#allocation22_spill]] }
 0x1b0   : > { %p28_p3 = scmp.ge.s32.totalorder %s1527_s27, 4  }
 0x1b1   : > { %s1531_s25 = smov %s1528_s9 }
 0x1b2   :  { %30 = sbr.rel (!%p28_p3) target bundleno = 13 (0xd), region = 127 }
 0x1b7   :  { %659 = vsyncpa [#allocation3], 1 }
 0x1b8   :  { %661 = vsyncpa [#allocation3 + $0x1], 1 }
 0x1b9   :  { %662 = vsyncpa [#allocation6], 1 }
 0x1ba   :  { %664 = vsyncpa [#allocation6 + $0x1], 1 }
 0x1bb   :  { %665 = vsyncpa [#allocation9], 1 }
 0x1bc   :  { %666 = vsyncpa [#allocation4], 1 }
 0x1bd   :  { %668 = vsyncpa [#allocation4 + $0x1], 1 }
 0x1be   :  { %669 = vsyncpa [#allocation12], 1 }
 0x1bf   :  { %671 = vsyncpa [#allocation12 + $0x1], 1 }

</bundles_post_ra>
